<compile_context>
chip_gen: v6e
topology: v6e:2x2x1
jax: 0.10.0
libtpu: 0.0.40
codegen_flags: <defaults>
</compile_context>

<pallas_src>
import functools

import jax
import jax.numpy as jnp
import numpy as np
from jax.experimental import pallas as pl
from jax.experimental.pallas import tpu as pltpu

_SCRATCH_BUDGET_BYTES = 6 * 1024 * 1024   # f32 accumulator scratch (single-buffered)
_MAX_TB = 256                             # batch-tile cap
_MAX_UNROLL = 64                          # deferred-accumulate unroll cap per chunk


def _sublane_base(itemsize: int) -> int:
    # f32 -> 8, bf16/f16 -> 16, 1-byte dtypes -> 32 (packed sublanes).
    return 8 * max(1, 4 // max(1, itemsize))


def _largest_div_mult(n: int, base: int, cap: int) -> int:
    """Largest multiple of `base` that divides n and is <= cap (0 if none)."""
    cap = min(cap, n)
    t = (cap // base) * base
    while t >= base:
        if n % t == 0:
            return t
        t -= base
    return 0


def _vmem_budgets() -> tuple[int, int]:
    """(vmem_limit_bytes, per-input-buffer tile byte budget), generation-aware."""
    try:
        phys = int(pltpu.get_tpu_info().vmem_capacity_bytes)
    except Exception:
        phys = 0
    if phys <= 0:
        phys = 64 * 1024 * 1024           # conservative default (v7x-sized VMEM)
    vmem_limit = int(min(96 * 1024 * 1024, (phys * 3) // 4))
    tile_budget = int(min(16 * 1024 * 1024,
                          max(2 * 1024 * 1024, (vmem_limit - 16 * 1024 * 1024) // 2)))
    return vmem_limit, tile_budget


# --------------------------------------------------------------------------
# Kernels
# --------------------------------------------------------------------------

def _reduce_mid_kernel(x_ref, o_ref, acc_ref, *, inv_n):
    # x_ref: (TB, TS, TH); o_ref: (TB, TH); acc_ref: (TB, LS, TH) f32 scratch.
    k = pl.program_id(2)

    @pl.when(k == 0)
    def _():
        acc_ref[...] = jnp.zeros_like(acc_ref)

    ls = acc_ref.shape[1]
    ts = x_ref.shape[1]
    if ls > 1:
        # Deferred sublane reduction: pure VPU adds of sublane-aligned slices;
        # the intra-vreg fold happens once in the finalize branch.
        acc = acc_ref[...]
        for j in range(ts // ls):
            acc = acc + x_ref[:, j * ls:(j + 1) * ls, :].astype(jnp.float32)
        acc_ref[...] = acc
    else:
        acc_ref[...] += jnp.sum(x_ref[...], axis=1, keepdims=True,
                                dtype=jnp.float32)

    @pl.when(k == pl.num_programs(2) - 1)
    def _():
        s = jnp.sum(acc_ref[...], axis=1, dtype=jnp.float32)
        o_ref[...] = (s * jnp.float32(inv_n)).astype(o_ref.dtype)


def _reduce_last_kernel(x_ref, o_ref, acc_ref, *, inv_n):
    # x_ref: (TB, TM, TR); o_ref: (TB, TM);
    # acc_ref: (TB, TM, 128) f32 (deferred) or (TB, TM) f32 (direct).
    k = pl.program_id(2)

    @pl.when(k == 0)
    def _():
        acc_ref[...] = jnp.zeros_like(acc_ref)

    if acc_ref.ndim == 3:
        # Deferred cross-lane reduction: add lane-aligned 128-wide slices into
        # a lane-resident partial (pure VPU); single XLU reduce at finalize.
        lw = acc_ref.shape[-1]
        acc = acc_ref[...]
        for j in range(x_ref.shape[-1] // lw):
            acc = acc + x_ref[:, :, j * lw:(j + 1) * lw].astype(jnp.float32)
        acc_ref[...] = acc
    else:
        acc_ref[...] += jnp.sum(x_ref[...], axis=-1, dtype=jnp.float32)

    @pl.when(k == pl.num_programs(2) - 1)
    def _():
        if acc_ref.ndim == 3:
            s = jnp.sum(acc_ref[...], axis=-1, dtype=jnp.float32)
        else:
            s = acc_ref[...]
        o_ref[...] = (s * jnp.float32(inv_n)).astype(o_ref.dtype)


# --------------------------------------------------------------------------
# Wrappers (tile selection + pallas_call)
# --------------------------------------------------------------------------

def _mean_mid(x3: jax.Array, *, vmem_limit: int, tile_budget: int) -> jax.Array:
    """x3: (B, S, H) -> (B, H), mean over axis 1 (no transpose required)."""
    B, S, H = x3.shape
    itemsize = x3.dtype.itemsize
    inv_n = 1.0 / S
    base_b = _sublane_base(itemsize)      # output sublane packing (out dtype == in dtype)
    base_s = _sublane_base(itemsize)      # input sublane packing on the reduced axis
    budget_elems = max(1, tile_budget // itemsize)

    # 1) Lane axis: lane-dense (multiple of 128) and as wide as the budget
    #    allows with a minimal (base_b x base_s) slab; fallback = full extent.
    th_cap = max(128, budget_elems // (base_b * min(S, base_s)))
    TH = _largest_div_mult(H, 128, th_cap) or H

    # 2) Reduction chunk (assuming TB == base_b).  Guarded fallback: never let
    #    an indivisible S request an unbounded full-extent input tile.
    ts_cap = max(base_s, budget_elems // max(1, base_b * TH))
    TS = _largest_div_mult(S, base_s, ts_cap)
    if TS == 0:
        if S * base_b * TH * itemsize <= 2 * tile_budget:
            TS = S                                   # full extent is affordable
        else:
            chunk = max(base_s, (ts_cap // base_s) * base_s)
            x3 = jnp.pad(x3, ((0, 0), (0, (-S) % chunk), (0, 0)))
            TS = chunk                               # zeros don't change the sum
    S_eff = x3.shape[1]

    # Deferred (pure-VPU) accumulation rows in the f32 scratch.
    LS = base_s if (TS % base_s == 0 and TS // base_s <= _MAX_UNROLL) else 1

    # 3) Batch tile: grow into the leftover byte/scratch budget (turns the
    #    ~128 KiB tiles of short-S CBOW shapes into multi-MiB tiles).
    tb_cap = max(1, min(_MAX_TB,
                        budget_elems // max(1, TS * TH),
                        _SCRATCH_BUDGET_BYTES // max(1, LS * TH * 4)))
    TB = (_largest_div_mult(B, base_b, tb_cap)
          or _largest_div_mult(B, 1, tb_cap) or 1)

    grid = (B // TB, H // TH, S_eff // TS)

    return pl.pallas_call(
        functools.partial(_reduce_mid_kernel, inv_n=inv_n),
        out_shape=jax.ShapeDtypeStruct((B, H), x3.dtype),
        grid_spec=pltpu.PrefetchScalarGridSpec(
            num_scalar_prefetch=0,
            grid=grid,
            in_specs=[pl.BlockSpec((TB, TS, TH), lambda bi, hi, k: (bi, k, hi))],
            out_specs=pl.BlockSpec((TB, TH), lambda bi, hi, k: (bi, hi)),
            scratch_shapes=[pltpu.VMEM((TB, LS, TH), jnp.float32)],
        ),
        compiler_params=pltpu.CompilerParams(
            dimension_semantics=("parallel", "parallel", "arbitrary"),
            vmem_limit_bytes=vmem_limit,
        ),
        cost_estimate=pl.CostEstimate(
            flops=B * S_eff * H,
            transcendentals=0,
            bytes_accessed=B * S_eff * H * itemsize + B * H * itemsize,
        ),
    )(x3)


def _mean_last(x3: jax.Array, *, vmem_limit: int, tile_budget: int) -> jax.Array:
    """x3: (B, M, R) -> (B, M), mean over the last (lane) axis."""
    B, M, R = x3.shape
    itemsize = x3.dtype.itemsize
    inv_n = 1.0 / R
    base_b = _sublane_base(itemsize)
    budget_elems = max(1, tile_budget // itemsize)

    # TM is both the input sublane dim and the output lane dim: multiple of
    # 128 or the full extent; bounded by the lane-partial scratch budget.
    tm_cap = max(128, min(budget_elems // max(1, base_b * min(R, 128)),
                          _SCRATCH_BUDGET_BYTES // (base_b * 128 * 4)))
    TM = _largest_div_mult(M, 128, tm_cap) or M

    # Reduction chunk on the lane axis (multiple of 128), guarded fallback.
    tr_cap = max(128, budget_elems // max(1, base_b * TM))
    TR = _largest_div_mult(R, 128, tr_cap)
    if TR == 0:
        if R * base_b * TM * itemsize <= 2 * tile_budget:
            TR = R
        else:
            chunk = max(128, (tr_cap // 128) * 128)
            x3 = jnp.pad(x3, ((0, 0), (0, 0), (0, (-R) % chunk)))
            TR = chunk                               # zeros don't change the sum
    R_eff = x3.shape[2]

    # Defer the cross-lane (XLU) reduce whenever the chunk is whole 128-lane tiles.
    defer = (TR % 128 == 0) and (TR // 128 <= _MAX_UNROLL)

    tb_cap = max(1, min(_MAX_TB,
                        budget_elems // max(1, TM * TR),
                        _SCRATCH_BUDGET_BYTES // max(1, TM * (128 if defer else 1) * 4)))
    TB = (_largest_div_mult(B, base_b, tb_cap)
          or _largest_div_mult(B, 1, tb_cap) or 1)

    scratch = (pltpu.VMEM((TB, TM, 128), jnp.float32) if defer
               else pltpu.VMEM((TB, TM), jnp.float32))

    grid = (B // TB, M // TM, R_eff // TR)

    return pl.pallas_call(
        functools.partial(_reduce_last_kernel, inv_n=inv_n),
        out_shape=jax.ShapeDtypeStruct((B, M), x3.dtype),
        grid_spec=pltpu.PrefetchScalarGridSpec(
            num_scalar_prefetch=0,
            grid=grid,
            in_specs=[pl.BlockSpec((TB, TM, TR), lambda bi, mi, k: (bi, mi, k))],
            out_specs=pl.BlockSpec((TB, TM), lambda bi, mi, k: (bi, mi)),
            scratch_shapes=[scratch],
        ),
        compiler_params=pltpu.CompilerParams(
            dimension_semantics=("parallel", "parallel", "arbitrary"),
            vmem_limit_bytes=vmem_limit,
        ),
        cost_estimate=pl.CostEstimate(
            flops=B * M * R_eff,
            transcendentals=0,
            bytes_accessed=B * M * R_eff * itemsize + B * M * itemsize,
        ),
    )(x3)


@functools.partial(jax.jit, static_argnames=("dim",))
def avg_pool(x: jax.Array, dim: int) -> jax.Array:
    """Pallas equivalent of torch.Tensor.mean(dim=dim) for float inputs."""
    if not jnp.issubdtype(x.dtype, jnp.floating):
        raise TypeError(f"avg_pool only supports floating dtypes, got {x.dtype}")
    ndim = x.ndim
    dim = dim % ndim
    shape = x.shape
    out_shape = shape[:dim] + shape[dim + 1:]
    vmem_limit, tile_budget = _vmem_budgets()

    if dim == ndim - 1:
        # Reduce over the last (lane) axis -- dedicated path, no transpose.
        if ndim == 1:
            x3 = x.reshape(1, 1, shape[0])
        else:
            B = int(np.prod(shape[:-2]))
            x3 = x.reshape(B, shape[-2], shape[-1])
        out = _mean_last(x3, vmem_limit=vmem_limit, tile_budget=tile_budget)
    else:
        # Keep the reduced axis in place: (pre dims, S, post dims) is a free
        # reshape -- no HBM transpose for any dim.
        B = int(np.prod(shape[:dim]))
        S = shape[dim]
        H = int(np.prod(shape[dim + 1:]))
        x3 = x.reshape(B, S, H)
        out = _mean_mid(x3, vmem_limit=vmem_limit, tile_budget=tile_budget)

    return out.reshape(out_shape)


if __name__ == "__main__":
    key = jax.random.PRNGKey(0)
    # CBOW-style input: (batch, seq, hidden), AvgPool(dim=1) over the sequence.
    batch, seq, hidden = 2, 8, 32
    x = jax.random.normal(key, (batch, seq, hidden), dtype=jnp.float32)

    # Primary (CBOW) case: dim=1 -> mid-axis reduction path.
    y = avg_pool(x, 1)
    jax.block_until_ready(y)
    y_ref = jnp.mean(x, axis=1)
    assert y.shape == y_ref.shape, (y.shape, y_ref.shape)
    assert y.dtype == y_ref.dtype, (y.dtype, y_ref.dtype)
    np.testing.assert_allclose(np.asarray(y), np.asarray(y_ref), rtol=1e-6, atol=1e-6)

    # Last-axis case: dim=-1 -> lane-reduction path (no transpose).
    y2 = avg_pool(x, -1)
    jax.block_until_ready(y2)
    y2_ref = jnp.mean(x, axis=-1)
    assert y2.shape == y2_ref.shape, (y2.shape, y2_ref.shape)
    assert y2.dtype == y2_ref.dtype, (y2.dtype, y2_ref.dtype)
    np.testing.assert_allclose(np.asarray(y2), np.asarray(y2_ref), rtol=1e-6, atol=1e-6)

    print("KERNEL_OK")
</pallas_src>

<mosaic_0001>
module attributes {stable_mosaic.version = 11 : i64} {
  func.func @_reduce_mid_kernel(%arg0: i32, %arg1: i32, %arg2: i32, %arg3: memref<2x8x32xf32, #tpu.memory_space<vmem>>, %arg4: memref<2x32xf32, #tpu.memory_space<vmem>>, %arg5: memref<2x8x32xf32, #tpu.memory_space<vmem>>) attributes {dimension_semantics = [#tpu.dimension_semantics<parallel>, #tpu.dimension_semantics<parallel>, #tpu.dimension_semantics<arbitrary>], iteration_bounds = array<i64: 1, 1, 1>, scalar_prefetch = 0 : i64, scratch_operands = 1 : i64, tpu.core_type = #tpu.core_type<tc>, window_params = [{transform_indices = @transform_0, window_bounds = array<i64: 2, 8, 32>}, {transform_indices = @transform_1, window_bounds = array<i64: 2, 32>}]} {
    %c0_i32 = arith.constant 0 : i32
    %0 = arith.cmpi eq, %arg2, %c0_i32 : i32
    %1 = arith.extui %0 : i1 to i32
    %c0_i32_0 = arith.constant 0 : i32
    %2 = arith.cmpi ne, %1, %c0_i32_0 : i32
    scf.if %2 {
      %cst = arith.constant 0.000000e+00 : f32
      %10 = vector.broadcast %cst : f32 to vector<2x8x32xf32>
      %c0_11 = arith.constant 0 : index
      %c0_12 = arith.constant 0 : index
      %c0_13 = arith.constant 0 : index
      %11 = vector.load %arg5[%c0_11, %c0_12, %c0_13] : memref<2x8x32xf32, #tpu.memory_space<vmem>>, vector<2x8x32xf32>
      tpu.vector_store %arg5[%c0_11, %c0_12, %c0_13], %10 {strides = array<i32>} : memref<2x8x32xf32, #tpu.memory_space<vmem>>, vector<2x8x32xf32>,
    } else {
    }
    %c0 = arith.constant 0 : index
    %c0_1 = arith.constant 0 : index
    %c0_2 = arith.constant 0 : index
    %3 = vector.load %arg5[%c0, %c0_1, %c0_2] : memref<2x8x32xf32, #tpu.memory_space<vmem>>, vector<2x8x32xf32>
    %c0_3 = arith.constant 0 : index
    %c0_4 = arith.constant 0 : index
    %c0_5 = arith.constant 0 : index
    %4 = vector.load %arg3[%c0_3, %c0_4, %c0_5] : memref<2x8x32xf32, #tpu.memory_space<vmem>>, vector<2x8x32xf32>
    %5 = arith.addf %3, %4 : vector<2x8x32xf32>
    %c0_6 = arith.constant 0 : index
    %c0_7 = arith.constant 0 : index
    %c0_8 = arith.constant 0 : index
    %6 = vector.load %arg5[%c0_6, %c0_7, %c0_8] : memref<2x8x32xf32, #tpu.memory_space<vmem>>, vector<2x8x32xf32>
    tpu.vector_store %arg5[%c0_6, %c0_7, %c0_8], %5 {strides = array<i32>} : memref<2x8x32xf32, #tpu.memory_space<vmem>>, vector<2x8x32xf32>,
    %c0_i32_9 = arith.constant 0 : i32
    %7 = arith.cmpi eq, %arg2, %c0_i32_9 : i32
    %8 = arith.extui %7 : i1 to i32
    %c0_i32_10 = arith.constant 0 : i32
    %9 = arith.cmpi ne, %8, %c0_i32_10 : i32
    scf.if %9 {
      %c0_11 = arith.constant 0 : index
      %c0_12 = arith.constant 0 : index
      %c0_13 = arith.constant 0 : index
      %10 = vector.load %arg5[%c0_11, %c0_12, %c0_13] : memref<2x8x32xf32, #tpu.memory_space<vmem>>, vector<2x8x32xf32>
      %cst = arith.constant dense<0.000000e+00> : vector<2x32xf32>
      %11 = vector.multi_reduction <add>, %10, %cst [1] : vector<2x8x32xf32> to vector<2x32xf32>
      %cst_14 = arith.constant 1.250000e-01 : f32
      %12 = vector.broadcast %cst_14 : f32 to vector<2x32xf32>
      %13 = arith.mulf %11, %12 : vector<2x32xf32>
      %c0_15 = arith.constant 0 : index
      %c0_16 = arith.constant 0 : index
      %14 = vector.load %arg4[%c0_15, %c0_16] : memref<2x32xf32, #tpu.memory_space<vmem>>, vector<2x32xf32>
      tpu.vector_store %arg4[%c0_15, %c0_16], %13 {strides = array<i32>} : memref<2x32xf32, #tpu.memory_space<vmem>>, vector<2x32xf32>,
    } else {
    }
    return
  }
  func.func @transform_0(%arg0: i32, %arg1: i32, %arg2: i32) -> (i32, i32, i32) {
    %c0_i32 = arith.constant 0 : i32
    return %arg0, %arg2, %arg1 : i32, i32, i32
  }
  func.func @transform_1(%arg0: i32, %arg1: i32, %arg2: i32) -> (i32, i32) {
    %c0_i32 = arith.constant 0 : i32
    return %arg0, %arg1 : i32, i32
  }
}

</mosaic_0001>

<bundles_post_ra>
// kernel: avg_pool.1
= control target key start
LH: loop header
LB: loop body
LE: loop exit
PB: predicated region body
PF: predicated region fallthrough
CT: control target
= control target key end

     0   :  { %6 = vsyncpa [#allocation4], 0  ;;  %s152_s0 = inlined_call_operand.hbm [shape: f32[2,8,32], index: 0, kind: input, shape index: {}]   ;;  %s153_s1 = inlined_call_operand.hbm [shape: f32[2,32], index: 1, kind: output, shape index: {}]  }
   0x1   :  { %7 = vsyncpa [#allocation5], 0  ;;  %s131_s6 = smov [#allocation3]  }
   0x2   :  { %s13_s7 = sshll.u32 %s131_s6, 4  ;;  %s14_s7 = int_to_ptr.vmem [resolvable:$true] %s13_s7 }
   0x3   :  { %s95_s8 = scalar_lea.vmem %s14_s7, 256  ;;  %p100_p1 = scmp.lt.s32.totalorder %s14_s7, %s14_s7 }
   0x4   :  { %p96_p0 = scmp.ne.s32.totalorder %s14_s7, %s95_s8  ;;  %p101_p2 = scmp.lt.s32.totalorder %s95_s8, %s95_s8 }
   0x6   :  { %p102_p3 = por %p101_p2, %p100_p1 }
   0x8   :  { %p103_p4 = pnand %p102_p3, %p96_p0 }
   0xa   :  { %106 = shalt.err (!%p103_p4)
}
   0xb   :  { %s132_s9 = smov 128   ;;  %s133_s10 = smov 8  }
   0xc   :  { %19 = dma.hbm_to_vmem [thread:$0]  %s152_s0, 256, %s14_s7, [#allocation4], %s132_s9, %s132_s9, %s133_s10  }
   0xd   :  { %127 = dma.done.wait [#allocation4], 256  }
   0xe   :  { %128 = vsyncadd [#allocation4], 4294967040  ;;  %vm27_vm0 = vcmask 261120   ;;  %v134_v0 = vmov 0.0   ;;  %v32_v1 = vld [vmem:[#allocation3] sm:$0xff]  ;;  %v33_v2 = vld [vmem:[#allocation3 + $0x8] sm:$0xff] }
   0xf   :  { %28 = vst.msk [vmem:[#allocation2] sm:$0xff] %vm27_vm0, %v134_v0  ;;  %29 = vst.msk [vmem:[#allocation2 + $0x8] sm:$0xff] %vm27_vm0, %v134_v0  ;;  %s135_s0 = smov [#allocation6]   ;;  %vm62_vm1 = vcmask 1041409   ;;  %vm65_vm2 = vcmask 254976  }
  0x10   :  { %s73_s13 = sshll.u32 %s135_s0, 4  ;;  %s74_s13 = int_to_ptr.vmem [resolvable:$true] %s73_s13 }
  0x11   :  { %s107_s14 = scalar_lea.vmem %s74_s13, 32  ;;  %p112_p6 = scmp.lt.s32.totalorder %s74_s13, %s74_s13 }
  0x12   :  { %p108_p5 = scmp.ne.s32.totalorder %s74_s13, %s107_s14  ;;  %p113_p7 = scmp.lt.s32.totalorder %s107_s14, %s107_s14 }
  0x14   :  { %p114_p8 = por %p113_p7, %p112_p6 }
  0x16   :  { %v30_v3 = vld [vmem:[#allocation2] sm:$0xff]  ;;  %v31_v4 = vld [vmem:[#allocation2 + $0x8] sm:$0xff]  ;;  %p115_p9 = pnand %p114_p8, %p108_p5 }
  0x17   :  { %v34_v5 = vadd.f32 %v32_v1, %v30_v3  ;;  %v35_v6 = vadd.f32 %v33_v2, %v31_v4 }
  0x19   :  { %37 = vst.msk [vmem:[#allocation2] sm:$0xff] %vm27_vm0, %v34_v5  ;;  %38 = vst.msk [vmem:[#allocation2 + $0x8] sm:$0xff] %vm27_vm0, %v35_v6 }
  0x20   :  { %v42_v7 = vld [vmem:[#allocation2] sm:$0xff]  ;;  %v43_v8 = vld [vmem:[#allocation2 + $0x8] sm:$0xff] }
  0x21   :  { %v44_v9 = vsel %vm27_vm0, %v42_v7, 0.0  ;;  %v51_v10 = vsel %vm27_vm0, %v43_v8, 0.0 }
  0x22   :  { %v45_v11 = vrot.slane %v44_v9, 4  ;;  %v52_v12 = vrot.slane %v51_v10, 4 }
  0x24   :  { %v46_v13 = vadd.f32 %v45_v11, %v44_v9  ;;  %v53_v14 = vadd.f32 %v52_v12, %v51_v10 }
  0x26   :  { %v47_v15 = vrot.slane %v46_v13, 2  ;;  %v54_v16 = vrot.slane %v53_v14, 2 }
  0x28   :  { %v48_v17 = vadd.f32 %v47_v15, %v46_v13  ;;  %v55_v18 = vadd.f32 %v54_v16, %v53_v14 }
  0x2a   :  { %v49_v19 = vrot.slane %v48_v17, 1  ;;  %v56_v20 = vrot.slane %v55_v18, 1 }
  0x2c   :  { %v50_v21 = vadd.f32 %v49_v19, %v48_v17  ;;  %v57_v22 = vadd.f32 %v56_v20, %v55_v18 }
  0x2e   :  { %v58_v23 = vmul.f32 0.125, %v50_v21  ;;  %v59_v24 = vmul.f32 0.125, %v57_v22 }
  0x30   :  { %v63_v25 = vsel %vm62_vm1, %v59_v24, %v58_v23 }
  0x31   :  { %66 = vst.msk [vmem:[#allocation6] sm:$0x3] %vm65_vm2, %v63_v25 }
  0x32   :  { %118 = shalt.err (!%p115_p9)
}
  0x33   :  { %76 = dma.vmem_to_hbm [thread:$0]  %s74_s13, 32, %s153_s1, [#allocation5]  }
  0x34   :  { %129 = dma.done.wait [#allocation5], 32  }
  0x35   :  { %130 = vsyncadd [#allocation5], 4294967264 }
  0x36   :  { %80 = vsyncpa [#allocation4], 1 }
  0x37   :  { %81 = vsyncpa [#allocation5], 1 }

</bundles_post_ra>
